<compile_context>
chip_gen: v6e
topology: v6e:2x2x1
jax: 0.10.0
libtpu: 0.0.40
codegen_flags: <defaults>
</compile_context>

<pallas_src>
import jax
import jax.numpy as jnp
from jax.experimental import pallas as pl
from jax.experimental.pallas import tpu as pltpu


_NEG_BIG = -1.0e30  # finite "-inf" for padded vocab columns (avoids NaN rescale)


def _round_up(x, m):
    return (x + m - 1) // m * m


def _lse_kernel(emb_ref, w_ref, b_ref, lse_ref, m_sc, l_sc):
    """Streaming (online) logsumexp over vocab tiles."""
    j = pl.program_id(0)

    @pl.when(j == 0)
    def _():
        m_sc[...] = jnp.full_like(m_sc, -jnp.inf)
        l_sc[...] = jnp.zeros_like(l_sc)

    # Hot path: MXU matmul for this vocab tile (native dtype, f32 accumulate).
    logits = jnp.dot(emb_ref[...], w_ref[...],
                     preferred_element_type=jnp.float32) + b_ref[...]   # (Np, tv)

    # Online logsumexp update over the vocab axis.
    m_new = jnp.maximum(m_sc[...], logits.max(axis=-1, keepdims=True))
    l_sc[...] = (l_sc[...] * jnp.exp(m_sc[...] - m_new)
                 + jnp.sum(jnp.exp(logits - m_new), axis=-1, keepdims=True))
    m_sc[...] = m_new

    # Finalize: per-row logsumexp.
    @pl.when(j == pl.num_programs(0) - 1)
    def _():
        lse_ref[...] = m_sc[...] + jnp.log(l_sc[...])


def _pick_tv(n_pad, d, emb_bytes, w_bytes, v):
    """Largest vocab tile (multiple of 256 where possible) under ~40 MiB VMEM."""
    budget = 40 * 1024 * 1024

    def footprint(tv):
        return (2 * d * tv * w_bytes       # double-buffered weight tiles
                + 2 * tv * 4               # double-buffered bias tiles
                + n_pad * d * emb_bytes    # resident embeddings
                + n_pad * tv * 4           # logits temporary
                + 4 * n_pad * 4)           # scratch accumulators

    cap = _round_up(v, 128)
    tv = min(2048, cap)
    if tv >= 256:
        tv = _round_up(tv, 256)
    while tv > 256 and footprint(tv) > budget:
        tv -= 256
    if tv == 256 and footprint(tv) > budget:
        tv = 128
    # TODO(synk): for very large D where even tv=128 overflows VMEM, a K
    # (D//tk) grid axis with an (Np, tv) accumulator would be needed.
    return tv


def softmax_loss(embeddings, softmax_w, softmax_b, targets, *, tv=None):
    """embeddings: [N, D], softmax_w: [D, V], softmax_b: [V], targets: [N] int.
    Returns scalar f32 loss (sum NLL). Dtypes of embeddings/softmax_w are kept
    native (bf16 recommended for large D*V)."""
    n, d = embeddings.shape
    d2, v = softmax_w.shape
    assert d == d2

    # Pad the token dim (MXU M dimension); padded rows are discarded below.
    n_pad = _round_up(max(n, 8), 128)
    if tv is None:
        tv = _pick_tv(n_pad, d, embeddings.dtype.itemsize,
                      softmax_w.dtype.itemsize, v)
    assert tv % 128 == 0
    v_pad = _round_up(v, tv)

    emb_p = jnp.zeros((n_pad, d), embeddings.dtype).at[:n].set(embeddings)
    if v_pad != v:
        w_p = jnp.zeros((d, v_pad), softmax_w.dtype).at[:, :v].set(softmax_w)
        b_p = jnp.full((v_pad,), _NEG_BIG, jnp.float32).at[:v].set(
            softmax_b.astype(jnp.float32))
    else:
        w_p = softmax_w
        b_p = softmax_b.astype(jnp.float32)
    b2d = b_p.reshape(1, v_pad)

    lse = pl.pallas_call(
        _lse_kernel,
        out_shape=jax.ShapeDtypeStruct((n_pad, 1), jnp.float32),
        grid_spec=pltpu.PrefetchScalarGridSpec(
            num_scalar_prefetch=0,
            grid=(v_pad // tv,),
            in_specs=[
                pl.BlockSpec((n_pad, d), lambda j: (0, 0)),   # embeddings (resident)
                pl.BlockSpec((d, tv), lambda j: (0, j)),      # weight vocab tile
                pl.BlockSpec((1, tv), lambda j: (0, j)),      # bias vocab tile
            ],
            out_specs=pl.BlockSpec((n_pad, 1), lambda j: (0, 0)),
            scratch_shapes=[
                pltpu.VMEM((n_pad, 1), jnp.float32),  # running max
                pltpu.VMEM((n_pad, 1), jnp.float32),  # running sum-exp
            ],
        ),
        compiler_params=pltpu.CompilerParams(
            dimension_semantics=("arbitrary",),
            vmem_limit_bytes=48 * 1024 * 1024),
    )(emb_p, w_p, b2d)

    # Target-logit gather hoisted out of the vocab loop (only N columns of W).
    tgt = targets.astype(jnp.int32)
    w_cols = jnp.take(softmax_w, tgt, axis=1)                          # [D, N]
    tgt_logits = (jnp.einsum('nd,dn->n', embeddings, w_cols,
                             preferred_element_type=jnp.float32)
                  + softmax_b[tgt].astype(jnp.float32))                # [N]

    # TODO(synk): PyTorch nll_loss's default ignore_index=-100 row skipping is
    # not implemented; the AllenNLP module sums every row, which we match.
    return jnp.sum(lse[:n, 0] - tgt_logits)


if __name__ == "__main__":
    # Small shapes consistent with the module: N tokens, embedding_dim, num_words.
    N, D, V = 8, 32, 256

    key = jax.random.PRNGKey(0)
    k_emb, k_w, k_tgt = jax.random.split(key, 3)

    # Deterministic parameter init (matches __init__ shapes / scaling).
    softmax_w = jax.random.normal(k_w, (D, V), dtype=jnp.float32) / jnp.sqrt(D)
    softmax_b = jnp.zeros((V,), dtype=jnp.float32)

    embeddings = jax.random.normal(k_emb, (N, D), dtype=jnp.float32)
    targets = jax.random.randint(k_tgt, (N,), 0, V, dtype=jnp.int32)

    loss = softmax_loss(embeddings, softmax_w, softmax_b, targets)
    loss = jax.block_until_ready(loss)

    # Pure-JAX reference check.
    logits = embeddings @ softmax_w + softmax_b
    logp = jax.nn.log_softmax(logits, axis=-1)
    ref = -jnp.sum(logp[jnp.arange(N), targets])
    assert jnp.allclose(loss, ref, rtol=1e-5, atol=1e-4), (loss, ref)

    print("KERNEL_OK")
</pallas_src>

<mosaic_0001>
module attributes {stable_mosaic.version = 11 : i64} {
  func.func @_lse_kernel(%arg0: i32, %arg1: memref<128x32xf32, #tpu.memory_space<vmem>>, %arg2: memref<32x256xf32, #tpu.memory_space<vmem>>, %arg3: memref<1x256xf32, #tpu.memory_space<vmem>>, %arg4: memref<128x1xf32, #tpu.memory_space<vmem>>, %arg5: memref<128x1xf32, #tpu.memory_space<vmem>>, %arg6: memref<128x1xf32, #tpu.memory_space<vmem>>) attributes {dimension_semantics = [#tpu.dimension_semantics<arbitrary>], iteration_bounds = array<i64: 1>, scalar_prefetch = 0 : i64, scratch_operands = 2 : i64, tpu.core_type = #tpu.core_type<tc>, window_params = [{pipeline_mode = #tpu.pipeline_mode<synchronous>, transform_indices = @transform_0, window_bounds = array<i64: 128, 32>}, {transform_indices = @transform_1, window_bounds = array<i64: 32, 256>}, {transform_indices = @transform_2, window_bounds = array<i64: 1, 256>}, {pipeline_mode = #tpu.pipeline_mode<synchronous>, transform_indices = @transform_3, window_bounds = array<i64: 128, 1>}]} {
    %c0_i32 = arith.constant 0 : i32
    %0 = arith.cmpi eq, %arg0, %c0_i32 : i32
    %1 = arith.extui %0 : i1 to i32
    %c0_i32_0 = arith.constant 0 : i32
    %2 = arith.cmpi ne, %1, %c0_i32_0 : i32
    scf.if %2 {
      %cst_20 = arith.constant 0xFF800000 : f32
      %29 = vector.broadcast %cst_20 : f32 to vector<128x1xf32>
      %c0_21 = arith.constant 0 : index
      %c0_22 = arith.constant 0 : index
      %30 = vector.load %arg5[%c0_21, %c0_22] : memref<128x1xf32, #tpu.memory_space<vmem>>, vector<128x1xf32>
      tpu.vector_store %arg5[%c0_21, %c0_22], %29 {strides = array<i32>} : memref<128x1xf32, #tpu.memory_space<vmem>>, vector<128x1xf32>,
      %cst_23 = arith.constant 0.000000e+00 : f32
      %31 = vector.broadcast %cst_23 : f32 to vector<128x1xf32>
      %c0_24 = arith.constant 0 : index
      %c0_25 = arith.constant 0 : index
      %32 = vector.load %arg6[%c0_24, %c0_25] : memref<128x1xf32, #tpu.memory_space<vmem>>, vector<128x1xf32>
      tpu.vector_store %arg6[%c0_24, %c0_25], %31 {strides = array<i32>} : memref<128x1xf32, #tpu.memory_space<vmem>>, vector<128x1xf32>,
    } else {
    }
    %c0 = arith.constant 0 : index
    %c0_1 = arith.constant 0 : index
    %3 = vector.load %arg1[%c0, %c0_1] : memref<128x32xf32, #tpu.memory_space<vmem>>, vector<128x32xf32>
    %c0_2 = arith.constant 0 : index
    %c0_3 = arith.constant 0 : index
    %4 = vector.load %arg2[%c0_2, %c0_3] : memref<32x256xf32, #tpu.memory_space<vmem>>, vector<32x256xf32>
    %cst = arith.constant dense<0.000000e+00> : vector<128x256xf32>
    %5 = tpu.matmul %3, %4, %cst {dimension_numbers = #tpu.dot_dimension_numbers<[1], [0], [0], [1], [0, 0, 1, 1], [], []>} : vector<128x32xf32>, vector<32x256xf32>, vector<128x256xf32> -> vector<128x256xf32>
    %c0_4 = arith.constant 0 : index
    %c0_5 = arith.constant 0 : index
    %6 = vector.load %arg3[%c0_4, %c0_5] : memref<1x256xf32, #tpu.memory_space<vmem>>, vector<1x256xf32>
    %7 = vector.broadcast %6 : vector<1x256xf32> to vector<128x256xf32>
    %8 = arith.addf %5, %7 : vector<128x256xf32>
    %c0_6 = arith.constant 0 : index
    %c0_7 = arith.constant 0 : index
    %9 = vector.load %arg5[%c0_6, %c0_7] : memref<128x1xf32, #tpu.memory_space<vmem>>, vector<128x1xf32>
    %cst_8 = arith.constant dense<0xFF800000> : vector<128xf32>
    %10 = vector.multi_reduction <maximumf>, %8, %cst_8 [1] : vector<128x256xf32> to vector<128xf32>
    %11 = vector.shape_cast %10 : vector<128xf32> to vector<128x1xf32>
    %12 = arith.maximumf %9, %11 : vector<128x1xf32>
    %c0_9 = arith.constant 0 : index
    %c0_10 = arith.constant 0 : index
    %13 = vector.load %arg6[%c0_9, %c0_10] : memref<128x1xf32, #tpu.memory_space<vmem>>, vector<128x1xf32>
    %c0_11 = arith.constant 0 : index
    %c0_12 = arith.constant 0 : index
    %14 = vector.load %arg5[%c0_11, %c0_12] : memref<128x1xf32, #tpu.memory_space<vmem>>, vector<128x1xf32>
    %15 = arith.subf %14, %12 : vector<128x1xf32>
    %16 = math.exp %15 : vector<128x1xf32>
    %17 = arith.mulf %13, %16 : vector<128x1xf32>
    %18 = vector.broadcast %12 : vector<128x1xf32> to vector<128x256xf32>
    %19 = arith.subf %8, %18 : vector<128x256xf32>
    %20 = math.exp %19 : vector<128x256xf32>
    %cst_13 = arith.constant dense<0.000000e+00> : vector<128xf32>
    %21 = vector.multi_reduction <add>, %20, %cst_13 [1] : vector<128x256xf32> to vector<128xf32>
    %22 = vector.shape_cast %21 : vector<128xf32> to vector<128x1xf32>
    %23 = arith.addf %17, %22 : vector<128x1xf32>
    %c0_14 = arith.constant 0 : index
    %c0_15 = arith.constant 0 : index
    %24 = vector.load %arg6[%c0_14, %c0_15] : memref<128x1xf32, #tpu.memory_space<vmem>>, vector<128x1xf32>
    tpu.vector_store %arg6[%c0_14, %c0_15], %23 {strides = array<i32>} : memref<128x1xf32, #tpu.memory_space<vmem>>, vector<128x1xf32>,
    %c0_16 = arith.constant 0 : index
    %c0_17 = arith.constant 0 : index
    %25 = vector.load %arg5[%c0_16, %c0_17] : memref<128x1xf32, #tpu.memory_space<vmem>>, vector<128x1xf32>
    tpu.vector_store %arg5[%c0_16, %c0_17], %12 {strides = array<i32>} : memref<128x1xf32, #tpu.memory_space<vmem>>, vector<128x1xf32>,
    %c0_i32_18 = arith.constant 0 : i32
    %26 = arith.cmpi eq, %arg0, %c0_i32_18 : i32
    %27 = arith.extui %26 : i1 to i32
    %c0_i32_19 = arith.constant 0 : i32
    %28 = arith.cmpi ne, %27, %c0_i32_19 : i32
    scf.if %28 {
      %c0_20 = arith.constant 0 : index
      %c0_21 = arith.constant 0 : index
      %29 = vector.load %arg5[%c0_20, %c0_21] : memref<128x1xf32, #tpu.memory_space<vmem>>, vector<128x1xf32>
      %c0_22 = arith.constant 0 : index
      %c0_23 = arith.constant 0 : index
      %30 = vector.load %arg6[%c0_22, %c0_23] : memref<128x1xf32, #tpu.memory_space<vmem>>, vector<128x1xf32>
      %31 = math.log %30 : vector<128x1xf32>
      %32 = arith.addf %29, %31 : vector<128x1xf32>
      %c0_24 = arith.constant 0 : index
      %c0_25 = arith.constant 0 : index
      %33 = vector.load %arg4[%c0_24, %c0_25] : memref<128x1xf32, #tpu.memory_space<vmem>>, vector<128x1xf32>
      tpu.vector_store %arg4[%c0_24, %c0_25], %32 {strides = array<i32>} : memref<128x1xf32, #tpu.memory_space<vmem>>, vector<128x1xf32>,
    } else {
    }
    return
  }
  func.func @transform_0(%arg0: i32) -> (i32, i32) {
    %c0_i32 = arith.constant 0 : i32
    %c0_i32_0 = arith.constant 0 : i32
    %c0_i32_1 = arith.constant 0 : i32
    return %c0_i32, %c0_i32_0 : i32, i32
  }
  func.func @transform_1(%arg0: i32) -> (i32, i32) {
    %c0_i32 = arith.constant 0 : i32
    %c0_i32_0 = arith.constant 0 : i32
    return %c0_i32, %arg0 : i32, i32
  }
  func.func @transform_2(%arg0: i32) -> (i32, i32) {
    %c0_i32 = arith.constant 0 : i32
    %c0_i32_0 = arith.constant 0 : i32
    return %c0_i32, %arg0 : i32, i32
  }
  func.func @transform_3(%arg0: i32) -> (i32, i32) {
    %c0_i32 = arith.constant 0 : i32
    %c0_i32_0 = arith.constant 0 : i32
    %c0_i32_1 = arith.constant 0 : i32
    return %c0_i32, %c0_i32_0 : i32, i32
  }
}

</mosaic_0001>

<bundles_post_ra>
// kernel: tpu_custom_call.1
= control target key start
LH: loop header
LB: loop body
LE: loop exit
PB: predicated region body
PF: predicated region fallthrough
CT: control target
= control target key end

     0   :  { %v990_v3 = vmov 0.0   ;;  %vm87_vm0 = vcmask 261120   ;;  %vm18_vm1 = vcmask 7168   ;;  %v991_v25 = vmov -inf   ;;  %s1620_s1 = inlined_call_operand.vmem [shape: f32[32,256], index: 1, kind: input, shape index: {}]   ;;  %s1621_s0 = inlined_call_operand.vmem [shape: f32[128,32], index: 0, kind: input, shape index: {}]   ;;  %s1622_s2 = inlined_call_operand.vmem [shape: f32[1,256], index: 2, kind: input, shape index: {}]   ;;  %s1623_s3 = inlined_call_operand.vmem [shape: f32[128,1], index: 3, kind: output, shape index: {}]  }
   0x1   :  { %v74_v0 = vld [vmem:[%s1620_s1 + $0x38] sm:$0xff]  ;;  %v73_v1 = vld [vmem:[%s1620_s1 + $0x30] sm:$0xff]  ;;  %v72_v2 = vld [vmem:[%s1620_s1 + $0x28] sm:$0xff]  ;;  %200 = vmatprep.mubr.f32.mxu0 %v990_v3  ;;  %248 = vmatprep.mubr.f32.mxu1 %v990_v3  ;;  %19 = vst.msk [vmem:[#allocation2] sm:$0xff] %vm18_vm1, %v991_v25  ;;  %v77_v26 = vlaneseq }
   0x2   :  { %160 = vmatprep.subr.mxu0 %v74_v0  ;;  %849 = vmatprep.subr.mxu1 %v74_v0  ;;  %v71_v4 = vld [vmem:[%s1620_s1 + $0x20] sm:$0xff]  ;;  %v70_v5 = vld [vmem:[%s1620_s1 + $0x18] sm:$0xff]  ;;  %v69_v6 = vld [vmem:[%s1620_s1 + $0x10] sm:$0xff]  ;;  %20 = vst.msk [vmem:[#allocation2 + $0x8] sm:$0xff] %vm18_vm1, %v991_v25 }
   0x3   :  { %161 = vmatpush1.msra.mxu0 %v73_v1  ;;  %853 = vmatpush1.msra.mxu1 %v73_v1  ;;  %v68_v7 = vld [vmem:[%s1620_s1 + $0x8] sm:$0xff]  ;;  %v67_v8 = vld [vmem:[%s1620_s1] sm:$0xff]  ;;  %v53_v13 = vld [vmem:[%s1621_s0 + $0x10] sm:$0xff]  ;;  %21 = vst.msk [vmem:[#allocation2 + $0x10] sm:$0xff] %vm18_vm1, %v991_v25  ;;  %v78_v27 = vshrl.u32 %v77_v26, 7 }
   0x4   :  { %162 = vmatprep.subr.mxu0 %v72_v2  ;;  %850 = vmatprep.subr.mxu1 %v72_v2  ;;  %v51_v9 = vld [vmem:[%s1621_s0] sm:$0xff]  ;;  %v52_v11 = vld [vmem:[%s1621_s0 + $0x8] sm:$0xff]  ;;  %v61_v14 = vld [vmem:[%s1621_s0 + $0x50] sm:$0xff]  ;;  %22 = vst.msk [vmem:[#allocation2 + $0x18] sm:$0xff] %vm18_vm1, %v991_v25 }
   0x5   :  { %163 = vmatpush1.msra.mxu0 %v71_v4  ;;  %854 = vmatpush1.msra.mxu1 %v71_v4  ;;  %v59_v10 = vld [vmem:[%s1621_s0 + $0x40] sm:$0xff]  ;;  %v60_v12 = vld [vmem:[%s1621_s0 + $0x48] sm:$0xff]  ;;  %v54_v15 = vld [vmem:[%s1621_s0 + $0x18] sm:$0xff]  ;;  %23 = vst.msk [vmem:[#allocation2 + $0x20] sm:$0xff] %vm18_vm1, %v991_v25  ;;  %v79_v28 = vsub.s32 0, %v78_v27  ;;  %v83_v29 = vsub.s32 1, %v78_v27 }
   0x6   :  { %164 = vmatprep.subr.mxu0 %v70_v5  ;;  %851 = vmatprep.subr.mxu1 %v70_v5  ;;  %v62_v16 = vld [vmem:[%s1621_s0 + $0x58] sm:$0xff]  ;;  %v55_v17 = vld [vmem:[%s1621_s0 + $0x20] sm:$0xff]  ;;  %v56_v19 = vld [vmem:[%s1621_s0 + $0x28] sm:$0xff]  ;;  %24 = vst.msk [vmem:[#allocation2 + $0x28] sm:$0xff] %vm18_vm1, %v991_v25 }
   0x7   :  { %165 = vmatpush1.msra.mxu0 %v69_v6  ;;  %855 = vmatpush1.msra.mxu1 %v69_v6  ;;  %v63_v18 = vld [vmem:[%s1621_s0 + $0x60] sm:$0xff]  ;;  %v64_v20 = vld [vmem:[%s1621_s0 + $0x68] sm:$0xff]  ;;  %v57_v21 = vld [vmem:[%s1621_s0 + $0x30] sm:$0xff]  ;;  %25 = vst.msk [vmem:[#allocation2 + $0x30] sm:$0xff] %vm18_vm1, %v991_v25 }
   0x8   :  { %166 = vmatprep.subr.mxu0 %v68_v7  ;;  %852 = vmatprep.subr.mxu1 %v68_v7  ;;  %v65_v22 = vld [vmem:[%s1621_s0 + $0x70] sm:$0xff]  ;;  %v58_v23 = vld [vmem:[%s1621_s0 + $0x38] sm:$0xff]  ;;  %26 = vst.msk [vmem:[#allocation2 + $0x38] sm:$0xff] %vm18_vm1, %v991_v25  ;;  %27 = vst.msk [vmem:[#allocation2 + $0x40] sm:$0xff] %vm18_vm1, %v991_v25 }
   0x9   :  { %167 = vmatpush1.msra.mxu0 %v67_v8  ;;  %856 = vmatpush1.msra.mxu1 %v67_v8  ;;  %v66_v24 = vld [vmem:[%s1621_s0 + $0x78] sm:$0xff]  ;;  %28 = vst.msk [vmem:[#allocation2 + $0x48] sm:$0xff] %vm18_vm1, %v991_v25  ;;  %29 = vst.msk [vmem:[#allocation2 + $0x50] sm:$0xff] %vm18_vm1, %v991_v25  ;;  %v75_v30 = vld [vmem:[%s1622_s2] sm:$0x3] }
   0xa   :  { %833 = vmatmul.mubr.msk.f32.vlgmr.msra.gmra.mxu0 %vm87_vm0, %v51_v9  ;;  %841 = vmatmul.mubr.msk.f32.vlgmr.msra.gmra.mxu1 %vm87_vm0, %v59_v10  ;;  %30 = vst.msk [vmem:[#allocation2 + $0x58] sm:$0xff] %vm18_vm1, %v991_v25  ;;  %31 = vst.msk [vmem:[#allocation2 + $0x60] sm:$0xff] %vm18_vm1, %v991_v25  ;;  %v1168_v31 = vrot.slane %v75_v30, %v79_v28  ;;  %v1170_v32 = vrot.slane %v75_v30, %v83_v29 }
   0xb   :  { %206 = vmatprep.mubr.f32.mxu0 %v990_v3  ;;  %254 = vmatprep.mubr.f32.mxu1 %v990_v3  ;;  %32 = vst.msk [vmem:[#allocation2 + $0x68] sm:$0xff] %vm18_vm1, %v991_v25  ;;  %33 = vst.msk [vmem:[#allocation2 + $0x70] sm:$0xff] %vm18_vm1, %v991_v25 }
   0xc   :  { %34 = vst.msk [vmem:[#allocation2 + $0x78] sm:$0xff] %vm18_vm1, %v991_v25  ;;  %35 = vst.msk [vmem:[#allocation3] sm:$0xff] %vm18_vm1, %v990_v3 }
   0xd   :  { %36 = vst.msk [vmem:[#allocation3 + $0x8] sm:$0xff] %vm18_vm1, %v990_v3  ;;  %37 = vst.msk [vmem:[#allocation3 + $0x10] sm:$0xff] %vm18_vm1, %v990_v3 }
   0xe   :  { %834 = vmatmul.mubr.msk.f32.gmra.mxu0 %vm87_vm0, %v52_v11  ;;  %842 = vmatmul.mubr.msk.f32.gmra.mxu1 %vm87_vm0, %v60_v12  ;;  %38 = vst.msk [vmem:[#allocation3 + $0x18] sm:$0xff] %vm18_vm1, %v990_v3  ;;  %39 = vst.msk [vmem:[#allocation3 + $0x20] sm:$0xff] %vm18_vm1, %v990_v3 }
   0xf   :  { %212 = vmatprep.mubr.f32.mxu0 %v990_v3  ;;  %260 = vmatprep.mubr.f32.mxu1 %v990_v3  ;;  %40 = vst.msk [vmem:[#allocation3 + $0x28] sm:$0xff] %vm18_vm1, %v990_v3  ;;  %41 = vst.msk [vmem:[#allocation3 + $0x30] sm:$0xff] %vm18_vm1, %v990_v3 }
  0x10   :  { %42 = vst.msk [vmem:[#allocation3 + $0x38] sm:$0xff] %vm18_vm1, %v990_v3  ;;  %43 = vst.msk [vmem:[#allocation3 + $0x40] sm:$0xff] %vm18_vm1, %v990_v3 }
  0x11   :  { %44 = vst.msk [vmem:[#allocation3 + $0x48] sm:$0xff] %vm18_vm1, %v990_v3  ;;  %45 = vst.msk [vmem:[#allocation3 + $0x50] sm:$0xff] %vm18_vm1, %v990_v3 }
  0x12   :  { %835 = vmatmul.mubr.msk.f32.gmra.mxu0 %vm87_vm0, %v53_v13  ;;  %843 = vmatmul.mubr.msk.f32.gmra.mxu1 %vm87_vm0, %v61_v14  ;;  %46 = vst.msk [vmem:[#allocation3 + $0x58] sm:$0xff] %vm18_vm1, %v990_v3  ;;  %47 = vst.msk [vmem:[#allocation3 + $0x60] sm:$0xff] %vm18_vm1, %v990_v3 }
  0x13   :  { %218 = vmatprep.mubr.f32.mxu0 %v990_v3  ;;  %266 = vmatprep.mubr.f32.mxu1 %v990_v3  ;;  %48 = vst.msk [vmem:[#allocation3 + $0x68] sm:$0xff] %vm18_vm1, %v990_v3  ;;  %49 = vst.msk [vmem:[#allocation3 + $0x70] sm:$0xff] %vm18_vm1, %v990_v3 }
  0x14   :  { %50 = vst.msk [vmem:[#allocation3 + $0x78] sm:$0xff] %vm18_vm1, %v990_v3 }
  0x16   :  { %836 = vmatmul.mubr.msk.f32.gmra.mxu0 %vm87_vm0, %v54_v15  ;;  %844 = vmatmul.mubr.msk.f32.gmra.mxu1 %vm87_vm0, %v62_v16 }
  0x17   :  { %224 = vmatprep.mubr.f32.mxu0 %v990_v3  ;;  %272 = vmatprep.mubr.f32.mxu1 %v990_v3 }
  0x1a   :  { %837 = vmatmul.mubr.msk.f32.gmra.mxu0 %vm87_vm0, %v55_v17  ;;  %845 = vmatmul.mubr.msk.f32.gmra.mxu1 %vm87_vm0, %v63_v18 }
  0x1b   :  { %230 = vmatprep.mubr.f32.mxu0 %v990_v3  ;;  %278 = vmatprep.mubr.f32.mxu1 %v990_v3 }
  0x1e   :  { %838 = vmatmul.mubr.msk.f32.gmra.mxu0 %vm87_vm0, %v56_v19  ;;  %846 = vmatmul.mubr.msk.f32.gmra.mxu1 %vm87_vm0, %v64_v20  ;;  %v992_v19 = vmov 0  }
  0x1f   :  { %236 = vmatprep.mubr.f32.mxu0 %v990_v3  ;;  %284 = vmatprep.mubr.f32.mxu1 %v990_v3 }
  0x20   :  { %860 = vset.pattern.permute.xlu0 %v992_v19  ;;  %861 = vset.pattern.permute.xlu1 %v992_v19  ;;  %v1419_v19 = vld [vmem:[#allocation2 + $0x70] sm:$0xff] }
  0x21   :  { %1649 = vst [vmem:[#allocation14_spill] sm:$0xff] %v1419_v19 }
  0x22   :  { %839 = vmatmul.mubr.msk.f32.gmra.mxu0 %vm87_vm0, %v57_v21  ;;  %847 = vmatmul.mubr.msk.f32.gmra.mxu1 %vm87_vm0, %v65_v22 }
  0x23   :  { %242 = vmatprep.mubr.f32.mxu0 %v990_v3  ;;  %290 = vmatprep.mubr.f32.mxu1 %v990_v3 }
  0x26   :  { %840 = vmatmul.mubr.msk.f32.gmra.mxu0 %vm87_vm0, %v58_v23  ;;  %848 = vmatmul.mubr.msk.f32.gmra.mxu1 %vm87_vm0, %v66_v24 }
  0xca   :  { %v202_v33 = vpop.f32.mrf.mxu0  ;;  %v250_v34 = vpop.f32.mrf.mxu1 }
  0xcb   :  { %v1173_v37 = vadd.f32 %v202_v33, %v1168_v31  ;;  %v1179_v41 = vadd.f32 %v250_v34, %v1168_v31 }
  0xcc   :  { %v204_v35 = vpop.f32.mrf.mxu0  ;;  %v252_v36 = vpop.f32.mrf.mxu1 }
  0xcd   :  { %v1176_v38 = vadd.f32 %v204_v35, %v1170_v32  ;;  %v1182_v42 = vadd.f32 %v252_v36, %v1170_v32 }
  0xce   :  { %v208_v39 = vpop.f32.mrf.mxu0  ;;  %v256_v40 = vpop.f32.mrf.mxu1 }
  0xcf   :  { %v1185_v43 = vadd.f32 %v256_v40, %v1168_v31  ;;  %v313_v44 = vmax.f32 %v1173_v37, %v1176_v38  ;;  %v1193_v48 = vadd.f32 %v208_v39, %v1168_v31  ;;  %v337_v54 = vmax.f32 %v1179_v41, %v1182_v42 }
  0xd0   :  { %v210_v45 = vpop.f32.mrf.mxu0  ;;  %v258_v46 = vpop.f32.mrf.mxu1 }
  0xd1   :  { %v1190_v47 = vadd.f32 %v258_v46, %v1170_v32  ;;  %314 = vmax.xlane.f32.xlu0 %v313_v44  ;;  %v1196_v51 = vadd.f32 %v210_v45, %v1170_v32 }
  0xd2   :  { %v214_v49 = vpop.f32.mrf.mxu0  ;;  %v262_v50 = vpop.f32.mrf.mxu1 }
  0xd3   :  { %v1199_v52 = vadd.f32 %v214_v49, %v1168_v31  ;;  %v340_v53 = vmax.f32 %v1185_v43, %v1190_v47  ;;  %v1209_v58 = vadd.f32 %v262_v50, %v1168_v31  ;;  %v316_v0 = vmax.f32 %v1193_v48, %v1196_v51 }
  0xd4   :  { %v216_v55 = vpop.f32.mrf.mxu0  ;;  %v264_v56 = vpop.f32.mrf.mxu1 }
  0xd5   :  { %v1206_v57 = vadd.f32 %v216_v55, %v1170_v32  ;;  %341 = vmax.xlane.f32.xlu1 %v340_v53  ;;  %338 = vmax.xlane.f32.xlu0 %v337_v54  ;;  %v1212_v59 = vadd.f32 %v264_v56, %v1170_v32 }
  0xd6   :  { %v220_v60 = vpop.f32.mrf.mxu0  ;;  %v268_v61 = vpop.f32.mrf.mxu1 }
  0xd7   :  { %v1215_v62 = vadd.f32 %v220_v60, %v1168_v31  ;;  %v319_v63 = vmax.f32 %v1199_v52, %v1206_v57  ;;  %v1222_v2 = vadd.f32 %v268_v61, %v1168_v31  ;;  %v343_v6 = vmax.f32 %v1209_v58, %v1212_v59 }
  0xd8   :  { %v222_v1 = vpop.f32.mrf.mxu0  ;;  %v270_v3 = vpop.f32.mrf.mxu1 }
  0xd9   :  { %v1225_v4 = vadd.f32 %v222_v1, %v1170_v32  ;;  %320 = vmax.xlane.f32.xlu1 %v319_v63  ;;  %317 = vmax.xlane.f32.xlu0 %v316_v0  ;;  %v1228_v5 = vadd.f32 %v270_v3, %v1170_v32  ;;  %v1300_v0 = vld [vmem:[#allocation2] sm:$0xff] }
  0xda   :  { %v226_v7 = vpop.f32.mrf.mxu0  ;;  %v274_v8 = vpop.f32.mrf.mxu1 }
  0xdb   :  { %v1233_v9 = vadd.f32 %v226_v7, %v1168_v31  ;;  %v322_v10 = vmax.f32 %v1215_v62, %v1225_v4  ;;  %v1238_v12 = vadd.f32 %v274_v8, %v1168_v31  ;;  %v346_v16 = vmax.f32 %v1222_v2, %v1228_v5 }
  0xdc   :  { %v228_v11 = vpop.f32.mrf.mxu0  ;;  %v276_v13 = vpop.f32.mrf.mxu1 }
  0xdd   :  { %v1241_v14 = vadd.f32 %v228_v11, %v1170_v32  ;;  %323 = vmax.xlane.f32.xlu1 %v322_v10  ;;  %344 = vmax.xlane.f32.xlu0 %v343_v6  ;;  %v1244_v15 = vadd.f32 %v276_v13, %v1170_v32  ;;  %v1307_v6 = vld [vmem:[#allocation2 + $0x40] sm:$0xff] }
  0xde   :  { %v232_v17 = vpop.f32.mrf.mxu0  ;;  %v280_v18 = vpop.f32.mrf.mxu1 }
  0xdf   :  { %v1249_v20 = vadd.f32 %v232_v17, %v1168_v31  ;;  %v325_v21 = vmax.f32 %v1233_v9, %v1241_v14  ;;  %v1254_v23 = vadd.f32 %v280_v18, %v1168_v31  ;;  %v349_v27 = vmax.f32 %v1238_v12, %v1244_v15  ;;  %v1322_v17 = vld [vmem:[#allocation2 + $0x8] sm:$0xff] }
  0xe0   :  { %v234_v22 = vpop.f32.mrf.mxu0  ;;  %v282_v24 = vpop.f32.mrf.mxu1 }
  0xe1   :  { %v1257_v25 = vadd.f32 %v234_v22, %v1170_v32  ;;  %347 = vmax.xlane.f32.xlu1 %v346_v16  ;;  %v1260_v26 = vadd.f32 %v282_v24, %v1170_v32  ;;  %326 = vmax.xlane.f32.xlu0 %v325_v21  ;;  %v1320_v16 = vld [vmem:[#allocation2 + $0x10] sm:$0xff] }
  0xe2   :  { %v238_v28 = vpop.f32.mrf.mxu0  ;;  %v286_v29 = vpop.f32.mrf.mxu1 }
  0xe3   :  { %v1265_v30 = vadd.f32 %v238_v28, %v1168_v31  ;;  %v328_v33 = vmax.f32 %v1249_v20, %v1257_v25  ;;  %v1270_v35 = vadd.f32 %v286_v29, %v1168_v31  ;;  %v352_v44 = vmax.f32 %v1254_v23, %v1260_v26  ;;  %v1340_v28 = vld [vmem:[#allocation2 + $0x18] sm:$0xff]  ;;  %v1342_v29 = vld [vmem:[#allocation2 + $0x50] sm:$0xff] }
  0xe4   :  { %v240_v34 = vpop.f32.mrf.mxu0  ;;  %v288_v36 = vpop.f32.mrf.mxu1 }
  0xe5   :  { %v1273_v39 = vadd.f32 %v240_v34, %v1170_v32  ;;  %329 = vmax.xlane.f32.xlu1 %v328_v33  ;;  %v1276_v40 = vadd.f32 %v288_v36, %v1170_v32  ;;  %350 = vmax.xlane.f32.xlu0 %v349_v27  ;;  %v1417_v33 = vld [vmem:[#allocation2 + $0x38] sm:$0xff] }
  0xe6   :  { %v244_v45 = vpop.f32.mrf.mxu0  ;;  %v292_v46 = vpop.f32.mrf.mxu1  ;;  %1648 = vst [vmem:[#allocation13_spill] sm:$0xff] %v1417_v33 }
  0xe7   :  { %v1281_v49 = vadd.f32 %v244_v45, %v1168_v31  ;;  %v331_v50 = vmax.f32 %v1265_v30, %v1273_v39  ;;  %v1286_v54 = vadd.f32 %v292_v46, %v1168_v31  ;;  %v355_v61 = vmax.f32 %v1270_v35, %v1276_v40 }
  0xe8   :  { %v246_v53 = vpop.f32.mrf.mxu0  ;;  %v294_v55 = vpop.f32.mrf.mxu1 }
  0xe9   :  { %v1289_v56 = vadd.f32 %v246_v53, %v1170_v32  ;;  %353 = vmax.xlane.f32.xlu1 %v352_v44  ;;  %v1292_v60 = vadd.f32 %v294_v55, %v1170_v32  ;;  %332 = vmax.xlane.f32.xlu0 %v331_v50  ;;  %v1305_v32 = vld [vmem:[#allocation2 + $0x48] sm:$0xff]  ;;  %v1359_v50 = vld [vmem:[#allocation2 + $0x58] sm:$0xff]  ;;  %v1361_v53 = vld [vmem:[#allocation2 + $0x20] sm:$0xff] }
  0xea   :  { %v1398_v55 = vld [vmem:[#allocation2 + $0x68] sm:$0xff] }
  0xeb   :  { %v334_v63 = vmax.f32 %v1281_v49, %v1289_v56  ;;  %v358_v31 = vmax.f32 %v1286_v54, %v1292_v60  ;;  %1644 = vst [vmem:[#allocation9_spill] sm:$0xff] %v1398_v55 }
  0xed   :  { %335 = vmax.xlane.f32.xlu1 %v334_v63  ;;  %356 = vmax.xlane.f32.xlu0 %v355_v61  ;;  %v1400_v61 = vld [vmem:[#allocation2 + $0x30] sm:$0xff] }
  0xee   :  { %1645 = vst [vmem:[#allocation10_spill] sm:$0xff] %v1400_v61 }
  0xf1   :  { %359 = vmax.xlane.f32.xlu1 %v358_v31 }
 0x15a   :  { %v315_v1 = vpop.xlane.xlu0 %314 }
 0x15b   :  { %v1303_v3 = vmax.f32 %v1300_v0, %v315_v1 }
 0x15d   :  { %714 = vst.msk [vmem:[#allocation2] sm:$0xff] %vm18_vm1, %v1303_v3  ;;  %459 = vperm.xlu0 %860, %v1303_v3  }
 0x15e   :  { %v342_v8 = vpop.xlane.xlu1 %341  ;;  %v339_v10 = vpop.xlane.xlu0 %338 }
 0x15f   :  { %v1315_v11 = vmax.f32 %v1305_v32, %v342_v8  ;;  %v1318_v13 = vmax.f32 %v1307_v6, %v339_v10  ;;  %v1378_v10 = vld [vmem:[#allocation2 + $0x28] sm:$0xff] }
 0x160   :  { %1640 = vst [vmem:[#allocation5_spill] sm:$0xff] %v1378_v10 }
 0x161   :  { %723 = vst.msk [vmem:[#allocation2 + $0x48] sm:$0xff] %vm18_vm1, %v1315_v11  ;;  %722 = vst.msk [vmem:[#allocation2 + $0x40] sm:$0xff] %vm18_vm1, %v1318_v13  ;;  %504 = vperm.xlu0 %860, %v1315_v11   ;;  %499 = vperm.xlu1 %861, %v1318_v13  }
 0x162   :  { %v321_v21 = vpop.xlane.xlu1 %320  ;;  %v318_v22 = vpop.xlane.xlu0 %317 }
 0x163   :  { %v1335_v24 = vmax.f32 %v1320_v16, %v321_v21  ;;  %v1338_v27 = vmax.f32 %v1322_v17, %v318_v22  ;;  %v1380_v21 = vld [vmem:[#allocation2 + $0x60] sm:$0xff] }
 0x164   :  { %1641 = vst [vmem:[#allocation6_spill] sm:$0xff] %v1380_v21 }
 0x165   :  { %716 = vst.msk [vmem:[#allocation2 + $0x10] sm:$0xff] %vm18_vm1, %v1335_v24  ;;  %715 = vst.msk [vmem:[#allocation2 + $0x8] sm:$0xff] %vm18_vm1, %v1338_v27  ;;  %464 = vperm.xlu1 %861, %v1338_v27  }
 0x166   :  { %v324_v36 = vpop.xlane.xlu1 %323  ;;  %v345_v44 = vpop.xlane.xlu0 %344 }
 0x167   :  { %v1354_v45 = vmax.f32 %v1340_v28, %v324_v36  ;;  %v1357_v46 = vmax.f32 %v1342_v29, %v345_v44 }
 0x169   :  { %717 = vst.msk [vmem:[#allocation2 + $0x18] sm:$0xff] %vm18_vm1, %v1354_v45  ;;  %724 = vst.msk [vmem:[#allocation2 + $0x50] sm:$0xff] %vm18_vm1, %v1357_v46  ;;  %469 = vperm.xlu1 %861, %v1335_v24  }
 0x16a   :  { %v348_v63 = vpop.xlane.xlu1 %347  ;;  %v327_v31 = vpop.xlane.xlu0 %326 }
 0x16b   :  { %v1373_v1 = vmax.f32 %v1359_v50, %v348_v63  ;;  %v1376_v8 = vmax.f32 %v1361_v53, %v327_v31 }
 0x16d   :  { %1639 = vst [vmem:[#allocation4_spill] sm:$0xff] %v1376_v8  ;;  %725 = vst.msk [vmem:[#allocation2 + $0x58] sm:$0xff] %vm18_vm1, %v1373_v1  ;;  %514 = vperm.xlu0 %860, %v1373_v1   ;;  %509 = vperm.xlu1 %861, %v1357_v46  }
 0x16e   :  { %718 = vst.msk [vmem:[#allocation2 + $0x20] sm:$0xff] %vm18_vm1, %v1376_v8  ;;  %v330_v44 = vpop.xlane.xlu1 %329  ;;  %v351_v63 = vpop.xlane.xlu0 %350 }
 0x16f   :  { %v1393_v31 = vmax.f32 %v1378_v10, %v330_v44  ;;  %v1396_v22 = vmax.f32 %v1380_v21, %v351_v63 }
 0x171   :  { %1642 = vst [vmem:[#allocation7_spill] sm:$0xff] %v1393_v31  ;;  %1643 = vst [vmem:[#allocation8_spill] sm:$0xff] %v1396_v22  ;;  %474 = vperm.xlu1 %861, %v1354_v45  }
 0x172   :  { %719 = vst.msk [vmem:[#allocation2 + $0x28] sm:$0xff] %vm18_vm1, %v1393_v31  ;;  %726 = vst.msk [vmem:[#allocation2 + $0x60] sm:$0xff] %vm18_vm1, %v1396_v22  ;;  %v354_v44 = vpop.xlane.xlu1 %353  ;;  %v333_v63 = vpop.xlane.xlu0 %332 }
 0x173   :  { %v1412_v34 = vmax.f32 %v1398_v55, %v354_v44  ;;  %v1415_v18 = vmax.f32 %v1400_v61, %v333_v63  ;;  %v1437_v55 = vld [vmem:[#allocation2 + $0x78] sm:$0xff] }
 0x174   :  { %1652 = vst [vmem:[#allocation17_spill] sm:$0xff] %v1437_v55 }
 0x175   :  { %1646 = vst [vmem:[#allocation11_spill] sm:$0xff] %v1412_v34  ;;  %1647 = vst [vmem:[#allocation12_spill] sm:$0xff] %v1415_v18  ;;  %524 = vperm.xlu0 %860, %v1412_v34   ;;  %479 = vperm.xlu1 %861, %v1376_v8  }
 0x176   :  { %727 = vst.msk [vmem:[#allocation2 + $0x68] sm:$0xff] %vm18_vm1, %v1412_v34  ;;  %720 = vst.msk [vmem:[#allocation2 + $0x30] sm:$0xff] %vm18_vm1, %v1415_v18  ;;  %v336_v63 = vpop.xlane.xlu1 %335  ;;  %v357_v36 = vpop.xlane.xlu0 %356 }
 0x177   :  { %v1432_v10 = vmax.f32 %v1417_v33, %v336_v63  ;;  %v1435_v7 = vmax.f32 %v1419_v19, %v357_v36 }
 0x179   :  { %1650 = vst [vmem:[#allocation15_spill] sm:$0xff] %v1432_v10  ;;  %1651 = vst [vmem:[#allocation16_spill] sm:$0xff] %v1435_v7  ;;  %519 = vperm.xlu1 %861, %v1396_v22  }
 0x17a   :  { %721 = vst.msk [vmem:[#allocation2 + $0x38] sm:$0xff] %vm18_vm1, %v1432_v10  ;;  %728 = vst.msk [vmem:[#allocation2 + $0x70] sm:$0xff] %vm18_vm1, %v1435_v7  ;;  %v360_v63 = vpop.xlane.xlu1 %359 }
 0x17b   :  { %v1449_v36 = vmax.f32 %v1437_v55, %v360_v63 }
 0x17d   :  { %1653 = vst [vmem:[#allocation18_spill] sm:$0xff] %v1449_v36  ;;  %729 = vst.msk [vmem:[#allocation2 + $0x78] sm:$0xff] %vm18_vm1, %v1449_v36  ;;  %534 = vperm.xlu0 %860, %v1449_v36   ;;  %484 = vperm.xlu1 %861, %v1393_v31  }
 0x181   :  { %489 = vperm.xlu1 %861, %v1415_v18  }
 0x185   :  { %494 = vperm.xlu1 %861, %v1432_v10  }
 0x189   :  { %529 = vperm.xlu1 %861, %v1435_v7  }
 0x1d8   :  { %v460_v44 = vpop.permute.xlu0 %459 }
 0x1d9   :  { %v537_v63 = vsub.f32 %v1173_v37, %v460_v44  ;;  %v538_v34 = vsub.f32 %v1176_v38, %v460_v44 }
 0x1db   :  { %v569_v19 = vmul.f32 1.442695, %v537_v63  ;;  %v571_v61 = vmul.f32 1.442695, %v538_v34 }
 0x1dc   :  { %v500_v55 = vpop.permute.xlu1 %499  ;;  %v505_v33 = vpop.permute.xlu0 %504 }
 0x1dd   :  { %862 = vpow2.f32 %v569_v19  ;;  %v553_v36 = vsub.f32 %v1179_v41, %v500_v55  ;;  %v554_v31 = vsub.f32 %v1182_v42, %v500_v55  ;;  %v555_v18 = vsub.f32 %v1185_v43, %v505_v33 }
 0x1de   :  { %864 = vpow2.f32 %v571_v61  ;;  %v556_v10 = vsub.f32 %v1190_v47, %v505_v33 }
 0x1df   :  { %v601_v7 = vmul.f32 1.442695, %v553_v36  ;;  %v603_v22 = vmul.f32 1.442695, %v554_v31  ;;  %v605_v21 = vmul.f32 1.442695, %v555_v18 }
 0x1e0   :  { %v607_v37 = vmul.f32 1.442695, %v556_v10  ;;  %v465_v8 = vpop.permute.xlu1 %464 }
 0x1e1   :  { %866 = vpow2.f32 %v601_v7  ;;  %v539_v38 = vsub.f32 %v1193_v48, %v465_v8  ;;  %v540_v34 = vsub.f32 %v1196_v51, %v465_v8 }
 0x1e2   :  { %868 = vpow2.f32 %v603_v22 }
 0x1e3   :  { %870 = vpow2.f32 %v605_v21  ;;  %v573_v41 = vmul.f32 1.442695, %v539_v38  ;;  %v575_v19 = vmul.f32 1.442695, %v540_v34 }
 0x1e4   :  { %872 = vpow2.f32 %v607_v37  ;;  %v470_v42 = vpop.permute.xlu1 %469 }
 0x1e5   :  { %874 = vpow2.f32 %v573_v41  ;;  %v541_v43 = vsub.f32 %v1199_v52, %v470_v42  ;;  %v542_v47 = vsub.f32 %v1206_v57, %v470_v42 }
 0x1e6   :  { %876 = vpow2.f32 %v575_v19 }
 0x1e7   :  { %v577_v18 = vmul.f32 1.442695, %v541_v43  ;;  %v579_v33 = vmul.f32 1.442695, %v542_v47 }
 0x1e8   :  { %v510_v55 = vpop.permute.xlu1 %509  ;;  %v515_v7 = vpop.permute.xlu0 %514 }
 0x1e9   :  { %878 = vpow2.f32 %v577_v18  ;;  %v557_v48 = vsub.f32 %v1209_v58, %v510_v55  ;;  %v558_v51 = vsub.f32 %v1212_v59, %v510_v55  ;;  %v559_v22 = vsub.f32 %v1222_v2, %v515_v7 }
 0x1ea   :  { %v863_v61 = vpop.eup %862  ;;  %880 = vpow2.f32 %v579_v33  ;;  %v560_v52 = vsub.f32 %v1228_v5, %v515_v7 }
 0x1eb   :  { %v865_v8 = vpop.eup %864  ;;  %v609_v10 = vmul.f32 1.442695, %v557_v48  ;;  %v611_v21 = vmul.f32 1.442695, %v558_v51  ;;  %v613_v59 = vmul.f32 1.442695, %v559_v22 }
 0x1ec   :  { %v475_v57 = vpop.permute.xlu1 %474  ;;  %v633_v31 = vadd.f32 %v865_v8, %v863_v61  ;;  %v615_v41 = vmul.f32 1.442695, %v560_v52 }
 0x1ed   :  { %882 = vpow2.f32 %v609_v10  ;;  %v543_v44 = vsub.f32 %v1215_v62, %v475_v57  ;;  %v544_v36 = vsub.f32 %v1225_v4, %v475_v57 }
 0x1ee   :  { %v867_v63 = vpop.eup %866  ;;  %884 = vpow2.f32 %v611_v21  ;;  %634 = vadd.xlane.f32.xlu1 %v633_v31 }
 0x1ef   :  { %v869_v58 = vpop.eup %868  ;;  %v581_v37 = vmul.f32 1.442695, %v543_v44  ;;  %v583_v38 = vmul.f32 1.442695, %v544_v36 }
 0x1f0   :  { %v871_v34 = vpop.eup %870  ;;  %v480_v19 = vpop.permute.xlu1 %479  ;;  %v657_v2 = vadd.f32 %v869_v58, %v867_v63 }
 0x1f1   :  { %v873_v42 = vpop.eup %872  ;;  %886 = vpow2.f32 %v581_v37  ;;  %v545_v5 = vsub.f32 %v1233_v9, %v480_v19  ;;  %v546_v43 = vsub.f32 %v1241_v14, %v480_v19  ;;  %v525_v55 = vpop.permute.xlu0 %524 }
 0x1f2   :  { %v875_v62 = vpop.eup %874  ;;  %888 = vpow2.f32 %v583_v38  ;;  %658 = vadd.xlane.f32.xlu0 %v657_v2  ;;  %v660_v4 = vadd.f32 %v873_v42, %v871_v34  ;;  %v563_v8 = vsub.f32 %v1254_v23, %v525_v55  ;;  %v564_v22 = vsub.f32 %v1260_v26, %v525_v55 }
 0x1f3   :  { %v877_v47 = vpop.eup %876  ;;  %890 = vpow2.f32 %v613_v59  ;;  %v585_v18 = vmul.f32 1.442695, %v545_v5  ;;  %v587_v33 = vmul.f32 1.442695, %v546_v43 }
 0x1f4   :  { %892 = vpow2.f32 %v615_v41  ;;  %661 = vadd.xlane.f32.xlu1 %v660_v4  ;;  %v520_v7 = vpop.permute.xlu1 %519  ;;  %v636_v48 = vadd.f32 %v877_v47, %v875_v62  ;;  %v621_v36 = vmul.f32 1.442695, %v563_v8  ;;  %v623_v59 = vmul.f32 1.442695, %v564_v22 }
 0x1f5   :  { %894 = vpow2.f32 %v585_v18  ;;  %v561_v51 = vsub.f32 %v1238_v12, %v520_v7  ;;  %v562_v9 = vsub.f32 %v1244_v15, %v520_v7 }
 0x1f6   :  { %v879_v61 = vpop.eup %878  ;;  %896 = vpow2.f32 %v587_v33  ;;  %637 = vadd.xlane.f32.xlu0 %v636_v48 }
 0x1f7   :  { %v881_v14 = vpop.eup %880  ;;  %v617_v10 = vmul.f32 1.442695, %v561_v51  ;;  %v619_v21 = vmul.f32 1.442695, %v562_v9 }
 0x1f8   :  { %v485_v52 = vpop.permute.xlu1 %484  ;;  %v639_v57 = vadd.f32 %v881_v14, %v879_v61  ;;  %v535_v23 = vpop.permute.xlu0 %534 }
 0x1f9   :  { %898 = vpow2.f32 %v617_v10  ;;  %v547_v31 = vsub.f32 %v1249_v20, %v485_v52  ;;  %v548_v44 = vsub.f32 %v1257_v25, %v485_v52  ;;  %v567_v25 = vsub.f32 %v1286_v54, %v535_v23 }
 0x1fa   :  { %v883_v12 = vpop.eup %882  ;;  %900 = vpow2.f32 %v619_v21  ;;  %640 = vadd.xlane.f32.xlu0 %v639_v57  ;;  %v568_v5 = vsub.f32 %v1292_v60, %v535_v23 }
 0x1fb   :  { %v885_v15 = vpop.eup %884  ;;  %v589_v63 = vmul.f32 1.442695, %v547_v31  ;;  %v591_v58 = vmul.f32 1.442695, %v548_v44  ;;  %v629_v33 = vmul.f32 1.442695, %v567_v25 }
 0x1fc   :  { %v490_v37 = vpop.permute.xlu1 %489  ;;  %v663_v38 = vadd.f32 %v885_v15, %v883_v12  ;;  %v631_v7 = vmul.f32 1.442695, %v568_v5 }
 0x1fd   :  { %902 = vpow2.f32 %v589_v63  ;;  %v549_v26 = vsub.f32 %v1265_v30, %v490_v37  ;;  %v550_v34 = vsub.f32 %v1273_v39, %v490_v37 }
 0x1fe   :  { %v887_v41 = vpop.eup %886  ;;  %904 = vpow2.f32 %v591_v58  ;;  %664 = vadd.xlane.f32.xlu0 %v663_v38 }
 0x1ff   :  { %v889_v20 = vpop.eup %888  ;;  %906 = vpow2.f32 %v621_v36  ;;  %v593_v19 = vmul.f32 1.442695, %v549_v26  ;;  %v595_v2 = vmul.f32 1.442695, %v550_v34  ;;  %v1654_v34 = vsub.f32 %v1300_v0, %v1303_v3 }
 0x200   :  { %v891_v42 = vpop.eup %890  ;;  %908 = vpow2.f32 %v623_v59  ;;  %v495_v43 = vpop.permute.xlu1 %494  ;;  %v642_v62 = vadd.f32 %v889_v20, %v887_v41  ;;  %v1655_v20 = vsub.f32 %v1307_v6, %v1318_v13  ;;  %v1659_v3 = vsub.f32 %v1342_v29, %v1357_v46  ;;  %v1662_v29 = vld [vmem:[#allocation4_spill] sm:$0xff] }
 0x201   :  { %v893_v4 = vpop.eup %892  ;;  %910 = vpow2.f32 %v593_v19  ;;  %v551_v30 = vsub.f32 %v1281_v49, %v495_v43  ;;  %v552_v39 = vsub.f32 %v1289_v56, %v495_v43  ;;  %v409_v41 = vmul.f32 1.442695, %v1654_v34 }
 0x202   :  { %v895_v47 = vpop.eup %894  ;;  %912 = vpow2.f32 %v595_v2  ;;  %643 = vadd.xlane.f32.xlu1 %v642_v62  ;;  %v666_v9 = vadd.f32 %v893_v4, %v891_v42  ;;  %v425_v25 = vmul.f32 1.442695, %v1655_v20  ;;  %v1656_v19 = vsub.f32 %v1305_v32, %v1315_v11  ;;  %v377_v62 = vld [vmem:[#allocation3] sm:$0xff] }
 0x203   :  { %v897_v18 = vpop.eup %896  ;;  %v597_v54 = vmul.f32 1.442695, %v551_v30  ;;  %v599_v55 = vmul.f32 1.442695, %v552_v39  ;;  %v1657_v42 = vsub.f32 %v1322_v17, %v1338_v27  ;;  %v1658_v43 = vsub.f32 %v1320_v16, %v1335_v24  ;;  %v385_v30 = vld [vmem:[#allocation3 + $0x40] sm:$0xff] }
 0x204   :  { %v530_v48 = vpop.permute.xlu1 %529  ;;  %v645_v51 = vadd.f32 %v897_v18, %v895_v47  ;;  %v427_v2 = vmul.f32 1.442695, %v1656_v19  ;;  %v429_v6 = vmul.f32 1.442695, %v1659_v3  ;;  %v1660_v32 = vsub.f32 %v1340_v28, %v1354_v45  ;;  %v386_v18 = vld [vmem:[#allocation3 + $0x48] sm:$0xff]  ;;  %v380_v19 = vld [vmem:[#allocation3 + $0x18] sm:$0xff] }
 0x205   :  { %914 = vpow2.f32 %v597_v54  ;;  %v565_v60 = vsub.f32 %v1270_v35, %v530_v48  ;;  %v566_v61 = vsub.f32 %v1276_v40, %v530_v48  ;;  %v411_v5 = vmul.f32 1.442695, %v1657_v42  ;;  %v1676_v42 = vld [vmem:[#allocation13_spill] sm:$0xff] }
 0x206   :  { %v899_v14 = vpop.eup %898  ;;  %916 = vpow2.f32 %v599_v55  ;;  %646 = vadd.xlane.f32.xlu0 %v645_v51  ;;  %667 = vadd.xlane.f32.xlu1 %v666_v9  ;;  %v413_v0 = vmul.f32 1.442695, %v1658_v43  ;;  %v415_v11 = vmul.f32 1.442695, %v1660_v32  ;;  %v1661_v24 = vsub.f32 %v1359_v50, %v1373_v1  ;;  %v378_v55 = vld [vmem:[#allocation3 + $0x8] sm:$0xff]  ;;  %v1664_v51 = vld [vmem:[#allocation6_spill] sm:$0xff] }
 0x207   :  { %v901_v49 = vpop.eup %900  ;;  %918 = vpow2.f32 %v629_v33  ;;  %v625_v56 = vmul.f32 1.442695, %v565_v60  ;;  %v627_v8 = vmul.f32 1.442695, %v566_v61  ;;  %v1663_v46 = vsub.f32 %v1361_v53, %v1662_v29  ;;  %v1665_v9 = vld [vmem:[#allocation8_spill] sm:$0xff] }
 0x208   :  { %920 = vpow2.f32 %v631_v7  ;;  %v669_v10 = vadd.f32 %v901_v49, %v899_v14  ;;  %v431_v47 = vmul.f32 1.442695, %v1661_v24  ;;  %v1666_v60 = vsub.f32 %v1664_v51, %v1665_v9  ;;  %v1682_v24 = vld [vmem:[#allocation17_spill] sm:$0xff] }
 0x209   :  { %922 = vpow2.f32 %v625_v56  ;;  %v417_v33 = vmul.f32 1.442695, %v1663_v46  ;;  %v379_v56 = vld [vmem:[#allocation3 + $0x10] sm:$0xff] }
 0x20a   :  { %v903_v21 = vpop.eup %902  ;;  %924 = vpow2.f32 %v627_v8  ;;  %670 = vadd.xlane.f32.xlu0 %v669_v10  ;;  %v433_v50 = vmul.f32 1.442695, %v1666_v60  ;;  %v1667_v10 = vld [vmem:[#allocation5_spill] sm:$0xff] }
 0x20b   :  { %v905_v22 = vpop.eup %904  ;;  %926 = vpow2.f32 %v409_v41 }
 0x20c   :  { %v907_v52 = vpop.eup %906  ;;  %v648_v57 = vadd.f32 %v905_v22, %v903_v21  ;;  %928 = vpow2.f32 %v425_v25  ;;  %v1668_v21 = vld [vmem:[#allocation7_spill] sm:$0xff] }
 0x20d   :  { %v909_v35 = vpop.eup %908  ;;  %930 = vpow2.f32 %v427_v2  ;;  %v1669_v22 = vsub.f32 %v1667_v10, %v1668_v21 }
 0x20e   :  { %v911_v31 = vpop.eup %910  ;;  %649 = vadd.xlane.f32.xlu1 %v648_v57  ;;  %v672_v12 = vadd.f32 %v909_v35, %v907_v52  ;;  %932 = vpow2.f32 %v411_v5  ;;  %v1677_v5 = vld [vmem:[#allocation15_spill] sm:$0xff] }
 0x20f   :  { %v913_v40 = vpop.eup %912  ;;  %934 = vpow2.f32 %v413_v0  ;;  %v419_v52 = vmul.f32 1.442695, %v1669_v22  ;;  %v1678_v43 = vsub.f32 %v1676_v42, %v1677_v5 }
 0x210   :  { %v651_v44 = vadd.f32 %v913_v40, %v911_v31  ;;  %936 = vpow2.f32 %v429_v6  ;;  %v1670_v40 = vld [vmem:[#allocation9_spill] sm:$0xff] }
 0x211   :  { %938 = vpow2.f32 %v415_v11  ;;  %v423_v0 = vmul.f32 1.442695, %v1678_v43  ;;  %v388_v11 = vld [vmem:[#allocation3 + $0x58] sm:$0xff] }
 0x212   :  { %v915_v15 = vpop.eup %914  ;;  %652 = vadd.xlane.f32.xlu0 %v651_v44  ;;  %673 = vadd.xlane.f32.xlu1 %v672_v12  ;;  %940 = vpow2.f32 %v431_v47  ;;  %v1671_v44 = vld [vmem:[#allocation11_spill] sm:$0xff]  ;;  %v1683_v47 = vld [vmem:[#allocation18_spill] sm:$0xff] }
 0x213   :  { %v917_v36 = vpop.eup %916  ;;  %942 = vpow2.f32 %v417_v33  ;;  %v1672_v12 = vsub.f32 %v1670_v40, %v1671_v44 }
 0x214   :  { %v919_v63 = vpop.eup %918  ;;  %v654_v58 = vadd.f32 %v917_v36, %v915_v15  ;;  %944 = vpow2.f32 %v433_v50  ;;  %v733_v50 = vld [vmem:[#allocation2] sm:$0xff] }
 0x215   :  { %v921_v59 = vpop.eup %920  ;;  %v435_v15 = vmul.f32 1.442695, %v1672_v12 }
 0x216   :  { %v923_v23 = vpop.eup %922  ;;  %655 = vadd.xlane.f32.xlu1 %v654_v58  ;;  %v678_v26 = vadd.f32 %v921_v59, %v919_v63  ;;  %v387_v63 = vld [vmem:[#allocation3 + $0x50] sm:$0xff] }
 0x217   :  { %v925_v37 = vpop.eup %924  ;;  %v1673_v59 = vld [vmem:[#allocation10_spill] sm:$0xff] }
 0x218   :  { %v675_v38 = vadd.f32 %v925_v37, %v923_v23  ;;  %v927_v13 = vpop.eup %926  ;;  %v1674_v23 = vld [vmem:[#allocation12_spill] sm:$0xff] }
 0x219   :  { %v441_v17 = vmul.f32 %v927_v13, %v377_v62  ;;  %v929_v27 = vpop.eup %928  ;;  %v1675_v37 = vsub.f32 %v1673_v59, %v1674_v23  ;;  %v383_v59 = vld [vmem:[#allocation3 + $0x30] sm:$0xff] }
 0x21a   :  { %676 = vadd.xlane.f32.xlu0 %v675_v38  ;;  %679 = vadd.xlane.f32.xlu1 %v678_v26  ;;  %v931_v16 = vpop.eup %930  ;;  %v449_v28 = vmul.f32 %v929_v27, %v385_v30  ;;  %v1679_v27 = vld [vmem:[#allocation14_spill] sm:$0xff] }
 0x21b   :  { %v933_v45 = vpop.eup %932  ;;  %v450_v7 = vmul.f32 %v931_v16, %v386_v18  ;;  %v421_v38 = vmul.f32 1.442695, %v1675_v37  ;;  %v1684_v18 = vsub.f32 %v1682_v24, %v1683_v47  ;;  %v391_v24 = vld [vmem:[#allocation3 + $0x70] sm:$0xff] }
 0x21c   :  { %v442_v53 = vmul.f32 %v933_v45, %v378_v55  ;;  %v935_v14 = vpop.eup %934 }
 0x21d   :  { %v443_v35 = vmul.f32 %v935_v14, %v379_v56  ;;  %v937_v31 = vpop.eup %936  ;;  %v439_v29 = vmul.f32 1.442695, %v1684_v18 }
 0x21e   :  { %v451_v34 = vmul.f32 %v937_v31, %v387_v63  ;;  %v939_v41 = vpop.eup %938 }
 0x21f   :  { %v941_v6 = vpop.eup %940  ;;  %v444_v13 = vmul.f32 %v939_v41, %v380_v19 }
 0x220   :  { %v943_v62 = vpop.eup %942 }
 0x221   :  { %v945_v33 = vpop.eup %944 }
 0x277   :  { %v635_v4 = vpop.xlane.xlu1 %634 }
 0x278   :  { %v681_v39 = vadd.f32 %v635_v4, %v441_v17  ;;  %v381_v17 = vld [vmem:[#allocation3 + $0x20] sm:$0xff] }
 0x279   :  { %v1680_v4 = vld [vmem:[#allocation16_spill] sm:$0xff]  ;;  %v445_v45 = vmul.f32 %v943_v62, %v381_v17 }
 0x27a   :  { %698 = vst.msk [vmem:[#allocation3] sm:$0xff] %vm18_vm1, %v681_v39  ;;  %v1681_v30 = vsub.f32 %v1679_v27, %v1680_v4 }
 0x27b   :  { %v659_v54 = vpop.xlane.xlu0 %658 }
 0x27c   :  { %v689_v48 = vadd.f32 %v659_v54, %v449_v28  ;;  %v437_v39 = vmul.f32 1.442695, %v1681_v30  ;;  %v452_v28 = vmul.f32 %v941_v6, %v388_v11 }
 0x27d   :  { %v662_v1 = vpop.xlane.xlu1 %661 }
 0x27e   :  { %v690_v61 = vadd.f32 %v662_v1, %v450_v7  ;;  %706 = vst.msk [vmem:[#allocation3 + $0x40] sm:$0xff] %vm18_vm1, %v689_v48  ;;  %v389_v48 = vld [vmem:[#allocation3 + $0x60] sm:$0xff] }
 0x27f   :  { %v638_v49 = vpop.xlane.xlu0 %637  ;;  %v453_v14 = vmul.f32 %v945_v33, %v389_v48 }
 0x280   :  { %707 = vst.msk [vmem:[#allocation3 + $0x48] sm:$0xff] %vm18_vm1, %v690_v61  ;;  %v682_v8 = vadd.f32 %v638_v49, %v442_v53 }
 0x281   :  { %v749_v57 = vld [vmem:[#allocation3] sm:$0xff] }
 0x282   :  { %946 = vlog2.f32 %v749_v57  ;;  %699 = vst.msk [vmem:[#allocation3 + $0x8] sm:$0xff] %vm18_vm1, %v682_v8  ;;  %v382_v8 = vld [vmem:[#allocation3 + $0x28] sm:$0xff]  ;;  %v741_v57 = vld [vmem:[#allocation2 + $0x40] sm:$0xff] }
 0x283   :  { %v641_v36 = vpop.xlane.xlu0 %640  ;;  %948 = vpow2.f32 %v419_v52 }
 0x284   :  { %v683_v58 = vadd.f32 %v641_v36, %v443_v35  ;;  %v742_v36 = vld [vmem:[#allocation2 + $0x48] sm:$0xff] }
 0x285   :  { %v757_v26 = vld [vmem:[#allocation3 + $0x40] sm:$0xff] }
 0x286   :  { %950 = vlog2.f32 %v757_v26  ;;  %700 = vst.msk [vmem:[#allocation3 + $0x10] sm:$0xff] %vm18_vm1, %v683_v58  ;;  %v390_v58 = vld [vmem:[#allocation3 + $0x68] sm:$0xff] }
 0x287   :  { %952 = vpow2.f32 %v435_v15  ;;  %v758_v20 = vld [vmem:[#allocation3 + $0x48] sm:$0xff]  ;;  %v665_v25 = vpop.xlane.xlu0 %664 }
 0x288   :  { %954 = vlog2.f32 %v758_v20  ;;  %v691_v2 = vadd.f32 %v665_v25, %v451_v34  ;;  %v734_v26 = vld [vmem:[#allocation2 + $0x8] sm:$0xff] }
 0x289   :  { %956 = vpow2.f32 %v421_v38  ;;  %v750_v3 = vld [vmem:[#allocation3 + $0x8] sm:$0xff] }
 0x28a   :  { %958 = vlog2.f32 %v750_v3  ;;  %708 = vst.msk [vmem:[#allocation3 + $0x50] sm:$0xff] %vm18_vm1, %v691_v2 }
 0x28b   :  { %v644_v32 = vpop.xlane.xlu1 %643  ;;  %960 = vpow2.f32 %v423_v0  ;;  %v384_v0 = vld [vmem:[#allocation3 + $0x38] sm:$0xff] }
 0x28c   :  { %v684_v16 = vadd.f32 %v644_v32, %v444_v13  ;;  %v735_v32 = vld [vmem:[#allocation2 + $0x10] sm:$0xff] }
 0x28d   :  { %v751_v46 = vld [vmem:[#allocation3 + $0x10] sm:$0xff] }
 0x28e   :  { %962 = vlog2.f32 %v751_v46  ;;  %701 = vst.msk [vmem:[#allocation3 + $0x18] sm:$0xff] %vm18_vm1, %v684_v16  ;;  %v392_v16 = vld [vmem:[#allocation3 + $0x78] sm:$0xff] }
 0x28f   :  { %v947_v54 = vpop.eup %946  ;;  %v668_v55 = vpop.xlane.xlu1 %667  ;;  %964 = vpow2.f32 %v437_v39 }
 0x290   :  { %v647_v7 = vpop.xlane.xlu0 %646  ;;  %v766_v51 = vmul.f32 0.6931472, %v947_v54  ;;  %v692_v9 = vadd.f32 %v668_v55, %v452_v28  ;;  %966 = vpow2.f32 %v439_v29  ;;  %v949_v61 = vpop.eup %948  ;;  %v743_v29 = vld [vmem:[#allocation2 + $0x50] sm:$0xff] }
 0x291   :  { %v685_v60 = vadd.f32 %v647_v7, %v445_v45  ;;  %v759_v1 = vld [vmem:[#allocation3 + $0x50] sm:$0xff]  ;;  %v446_v12 = vmul.f32 %v949_v61, %v382_v8 }
 0x292   :  { %v797_v53 = vadd.f32 %v766_v51, %v733_v50  ;;  %968 = vlog2.f32 %v759_v1  ;;  %709 = vst.msk [vmem:[#allocation3 + $0x58] sm:$0xff] %vm18_vm1, %v692_v9 }
 0x293   :  { %702 = vst.msk [vmem:[#allocation3 + $0x20] sm:$0xff] %vm18_vm1, %v685_v60  ;;  %v951_v49 = vpop.eup %950  ;;  %v736_v60 = vld [vmem:[#allocation2 + $0x18] sm:$0xff] }
 0x294   :  { %v671_v56 = vpop.xlane.xlu0 %670  ;;  %v953_v10 = vpop.eup %952  ;;  %813 = vst.msk [vmem:[%s1623_s3] sm:$0xff] %vm18_vm1, %v797_v53  ;;  %v782_v21 = vmul.f32 0.6931472, %v951_v49 }
 0x295   :  { %v693_v22 = vadd.f32 %v671_v56, %v453_v14  ;;  %v955_v52 = vpop.eup %954  ;;  %v752_v35 = vld [vmem:[#allocation3 + $0x18] sm:$0xff]  ;;  %v454_v19 = vmul.f32 %v953_v10, %v390_v58 }
 0x296   :  { %v957_v31 = vpop.eup %956  ;;  %v784_v40 = vmul.f32 0.6931472, %v955_v52  ;;  %v805_v44 = vadd.f32 %v782_v21, %v741_v57  ;;  %970 = vlog2.f32 %v752_v35  ;;  %v744_v56 = vld [vmem:[#allocation2 + $0x58] sm:$0xff]  ;;  %v737_v21 = vld [vmem:[#allocation2 + $0x20] sm:$0xff] }
 0x297   :  { %710 = vst.msk [vmem:[#allocation3 + $0x60] sm:$0xff] %vm18_vm1, %v693_v22  ;;  %v959_v15 = vpop.eup %958  ;;  %v650_v63 = vpop.xlane.xlu1 %649  ;;  %v447_v2 = vmul.f32 %v957_v31, %v383_v59  ;;  %v745_v31 = vld [vmem:[#allocation2 + $0x60] sm:$0xff] }
 0x298   :  { %v806_v23 = vadd.f32 %v784_v40, %v742_v36  ;;  %821 = vst.msk [vmem:[%s1623_s3 + $0x40] sm:$0xff] %vm18_vm1, %v805_v44  ;;  %v768_v37 = vmul.f32 0.6931472, %v959_v15  ;;  %v686_v38 = vadd.f32 %v650_v63, %v446_v12  ;;  %v961_v20 = vpop.eup %960  ;;  %v738_v63 = vld [vmem:[#allocation2 + $0x28] sm:$0xff] }
 0x299   :  { %v760_v34 = vld [vmem:[#allocation3 + $0x58] sm:$0xff]  ;;  %v448_v4 = vmul.f32 %v961_v20, %v384_v0 }
 0x29a   :  { %v753_v41 = vld [vmem:[#allocation3 + $0x20] sm:$0xff]  ;;  %822 = vst.msk [vmem:[%s1623_s3 + $0x48] sm:$0xff] %vm18_vm1, %v806_v23  ;;  %v798_v25 = vadd.f32 %v768_v37, %v734_v26  ;;  %972 = vlog2.f32 %v760_v34  ;;  %703 = vst.msk [vmem:[#allocation3 + $0x28] sm:$0xff] %vm18_vm1, %v686_v38  ;;  %v746_v38 = vld [vmem:[#allocation2 + $0x68] sm:$0xff] }
 0x29b   :  { %v963_v42 = vpop.eup %962  ;;  %974 = vlog2.f32 %v753_v41  ;;  %v674_v5 = vpop.xlane.xlu1 %673  ;;  %v739_v34 = vld [vmem:[#allocation2 + $0x30] sm:$0xff] }
 0x29c   :  { %v653_v43 = vpop.xlane.xlu0 %652  ;;  %814 = vst.msk [vmem:[%s1623_s3 + $0x8] sm:$0xff] %vm18_vm1, %v798_v25  ;;  %v770_v3 = vmul.f32 0.6931472, %v963_v42  ;;  %v694_v6 = vadd.f32 %v674_v5, %v454_v19  ;;  %v965_v62 = vpop.eup %964 }
 0x29d   :  { %v687_v13 = vadd.f32 %v653_v43, %v447_v2  ;;  %v967_v17 = vpop.eup %966  ;;  %v455_v45 = vmul.f32 %v965_v62, %v391_v24  ;;  %v740_v2 = vld [vmem:[#allocation2 + $0x38] sm:$0xff] }
 0x29e   :  { %v761_v11 = vld [vmem:[#allocation3 + $0x60] sm:$0xff]  ;;  %v799_v27 = vadd.f32 %v770_v3, %v735_v32  ;;  %711 = vst.msk [vmem:[#allocation3 + $0x68] sm:$0xff] %vm18_vm1, %v694_v6  ;;  %v456_v28 = vmul.f32 %v967_v17, %v392_v16  ;;  %v748_v3 = vld [vmem:[#allocation2 + $0x78] sm:$0xff] }
 0x29f   :  { %976 = vlog2.f32 %v761_v11  ;;  %704 = vst.msk [vmem:[#allocation3 + $0x30] sm:$0xff] %vm18_vm1, %v687_v13  ;;  %v969_v30 = vpop.eup %968  ;;  %v656_v39 = vpop.xlane.xlu1 %655  ;;  %v747_v13 = vld [vmem:[#allocation2 + $0x70] sm:$0xff] }
 0x2a0   :  { %815 = vst.msk [vmem:[%s1623_s3 + $0x10] sm:$0xff] %vm18_vm1, %v799_v27  ;;  %v786_v47 = vmul.f32 0.6931472, %v969_v30  ;;  %v688_v18 = vadd.f32 %v656_v39, %v448_v4 }
 0x2a1   :  { %v754_v46 = vld [vmem:[#allocation3 + $0x28] sm:$0xff] }
 0x2a2   :  { %v807_v33 = vadd.f32 %v786_v47, %v743_v29  ;;  %978 = vlog2.f32 %v754_v46  ;;  %705 = vst.msk [vmem:[#allocation3 + $0x38] sm:$0xff] %vm18_vm1, %v688_v18 }
 0x2a3   :  { %v971_v54 = vpop.eup %970  ;;  %v680_v55 = vpop.xlane.xlu1 %679 }
 0x2a4   :  { %v677_v7 = vpop.xlane.xlu0 %676  ;;  %823 = vst.msk [vmem:[%s1623_s3 + $0x50] sm:$0xff] %vm18_vm1, %v807_v33  ;;  %v772_v48 = vmul.f32 0.6931472, %v971_v54  ;;  %v696_v51 = vadd.f32 %v680_v55, %v456_v28 }
 0x2a5   :  { %v695_v9 = vadd.f32 %v677_v7, %v455_v45  ;;  %v762_v50 = vld [vmem:[#allocation3 + $0x68] sm:$0xff] }
 0x2a6   :  { %v755_v1 = vld [vmem:[#allocation3 + $0x30] sm:$0xff]  ;;  %v800_v61 = vadd.f32 %v772_v48, %v736_v60  ;;  %980 = vlog2.f32 %v762_v50  ;;  %713 = vst.msk [vmem:[#allocation3 + $0x78] sm:$0xff] %vm18_vm1, %v696_v51 }
 0x2a7   :  { %712 = vst.msk [vmem:[#allocation3 + $0x70] sm:$0xff] %vm18_vm1, %v695_v9  ;;  %v973_v53 = vpop.eup %972  ;;  %982 = vlog2.f32 %v755_v1 }
 0x2a8   :  { %v975_v14 = vpop.eup %974  ;;  %816 = vst.msk [vmem:[%s1623_s3 + $0x18] sm:$0xff] %vm18_vm1, %v800_v61  ;;  %v788_v49 = vmul.f32 0.6931472, %v973_v53 }
 0x2a9   :  { %v774_v8 = vmul.f32 0.6931472, %v975_v14  ;;  %v756_v10 = vld [vmem:[#allocation3 + $0x38] sm:$0xff] }
 0x2aa   :  { %v808_v22 = vadd.f32 %v788_v49, %v744_v56  ;;  %984 = vlog2.f32 %v756_v10 }
 0x2ab   :  { %v801_v57 = vadd.f32 %v774_v8, %v737_v21 }
 0x2ac   :  { %v977_v52 = vpop.eup %976  ;;  %824 = vst.msk [vmem:[%s1623_s3 + $0x58] sm:$0xff] %vm18_vm1, %v808_v22 }
 0x2ad   :  { %v790_v35 = vmul.f32 0.6931472, %v977_v52  ;;  %817 = vst.msk [vmem:[%s1623_s3 + $0x20] sm:$0xff] %vm18_vm1, %v801_v57  ;;  %v764_v40 = vld [vmem:[#allocation3 + $0x78] sm:$0xff] }
 0x2ae   :  { %v763_v44 = vld [vmem:[#allocation3 + $0x70] sm:$0xff]  ;;  %986 = vlog2.f32 %v764_v40 }
 0x2af   :  { %v809_v12 = vadd.f32 %v790_v35, %v745_v31  ;;  %v979_v15 = vpop.eup %978  ;;  %988 = vlog2.f32 %v763_v44 }
 0x2b0   :  { %v776_v36 = vmul.f32 0.6931472, %v979_v15 }
 0x2b1   :  { %825 = vst.msk [vmem:[%s1623_s3 + $0x60] sm:$0xff] %vm18_vm1, %v809_v12 }
 0x2b2   :  { %v802_v58 = vadd.f32 %v776_v36, %v738_v63 }
 0x2b3   :  { %v981_v59 = vpop.eup %980 }
 0x2b4   :  { %v983_v23 = vpop.eup %982  ;;  %818 = vst.msk [vmem:[%s1623_s3 + $0x28] sm:$0xff] %vm18_vm1, %v802_v58  ;;  %v792_v37 = vmul.f32 0.6931472, %v981_v59 }
 0x2b5   :  { %v778_v26 = vmul.f32 0.6931472, %v983_v23 }
 0x2b6   :  { %v810_v41 = vadd.f32 %v792_v37, %v746_v38 }
 0x2b7   :  { %v985_v20 = vpop.eup %984  ;;  %v803_v25 = vadd.f32 %v778_v26, %v739_v34 }
 0x2b8   :  { %826 = vst.msk [vmem:[%s1623_s3 + $0x68] sm:$0xff] %vm18_vm1, %v810_v41  ;;  %v780_v19 = vmul.f32 0.6931472, %v985_v20 }
 0x2b9   :  { %819 = vst.msk [vmem:[%s1623_s3 + $0x30] sm:$0xff] %vm18_vm1, %v803_v25 }
 0x2ba   :  { %v804_v42 = vadd.f32 %v780_v19, %v740_v2 }
 0x2bb   :  { %v987_v5 = vpop.eup %986 }
 0x2bc   :  { %v989_v43 = vpop.eup %988  ;;  %820 = vst.msk [vmem:[%s1623_s3 + $0x38] sm:$0xff] %vm18_vm1, %v804_v42  ;;  %v796_v0 = vmul.f32 0.6931472, %v987_v5 }
 0x2bd   :  { %v794_v6 = vmul.f32 0.6931472, %v989_v43 }
 0x2be   :  { %v812_v62 = vadd.f32 %v796_v0, %v748_v3 }
 0x2bf   :  { %v811_v32 = vadd.f32 %v794_v6, %v747_v13 }
 0x2c0   :  { %828 = vst.msk [vmem:[%s1623_s3 + $0x78] sm:$0xff] %vm18_vm1, %v812_v62 }
 0x2c1   :  { %827 = vst.msk [vmem:[%s1623_s3 + $0x70] sm:$0xff] %vm18_vm1, %v811_v32 }

</bundles_post_ra>
